<compile_context>
chip_gen: v5e
topology: v5e:2x2
jax: 0.10.0
libtpu: 0.0.40
codegen_flags: <defaults>
</compile_context>

<pallas_src>
import math
import functools

import jax
import jax.numpy as jnp
from jax.experimental import pallas as pl
from jax.experimental.pallas import tpu as pltpu

LANE = 128      # lane width: output-feature dim padded to multiples of this
SUBLANE = 8     # sublane width: batch tiles rounded to multiples of this


def _round_up(x, m):
    return ((x + m - 1) // m) * m


def _cdiv(a, b):
    return (a + b - 1) // b


def _vmem_capacity_bytes():
    try:
        return int(pltpu.get_tpu_info().vmem_capacity_bytes)
    except Exception:
        return 64 << 20   # assume the tightest budget (v7x: 64 MiB per TensorCore)


# ----------------------------- Pallas kernels --------------------------------
def _noisy_linear_train_kernel(x_ref, w_mu_ref, w_sig_ref, eps_in_ref, eps_out_ref,
                               b_mu_ref, b_sig_ref, out_ref, w_eff_ref, b_eff_ref):
    # grid = (N-blocks, batch-blocks); batch is the inner 'arbitrary' axis, so the noisy
    # weight panel for this N-block is folded exactly once (per core, per j) into VMEM
    # scratch and reused for every streamed batch tile.
    @pl.when(pl.program_id(1) == 0)
    def _fold():
        eps_w = eps_in_ref[...] * eps_out_ref[...]                       # (K,1)*(1,TN)->(K,TN)
        w = (w_mu_ref[...].astype(jnp.float32)
             + w_sig_ref[...].astype(jnp.float32) * eps_w)
        w_eff_ref[...] = w.astype(jnp.bfloat16)                          # bf16 MXU operand
        b_eff_ref[...] = b_mu_ref[...] + b_sig_ref[...] * eps_out_ref[...]

    x = x_ref[...].astype(jnp.bfloat16)                                  # bf16 MXU operand
    y = jnp.dot(x, w_eff_ref[...], preferred_element_type=jnp.float32)   # f32 accumulate
    out_ref[...] = y + b_eff_ref[...]


def _noisy_linear_eval_kernel(x_ref, w_mu_ref, b_mu_ref, out_ref):
    # Specialized eval path: mu only -- no sigma/eps DMA, no fold.
    x = x_ref[...].astype(jnp.bfloat16)
    y = jnp.dot(x, w_mu_ref[...], preferred_element_type=jnp.float32)
    out_ref[...] = y + b_mu_ref[...]


# --------------------------- noise (factorized) ------------------------------
def _factorized_noise(key, in_features, out_features):
    """NoisyLinear.reset_noise(): f(x) = sign(x) * sqrt(|x|)."""
    ki, kj = jax.random.split(key)
    f = lambda v: jnp.sign(v) * jnp.sqrt(jnp.abs(v))
    eps_i = f(jax.random.normal(ki, (in_features,), jnp.float32))
    eps_j = f(jax.random.normal(kj, (out_features,), jnp.float32))
    return eps_i, eps_j


# ------------------------------ forward --------------------------------------
@functools.partial(jax.jit, static_argnames=("in_features", "out_features", "training"))
def noisy_linear_forward(x, kparams, noise_key, *, in_features, out_features, training):
    """Fused NoisyLinear forward.

    x: (B, in_features) f32
    kparams: dict from prepare_kernel_params() -- (in, out)-layout, lane-padded N,
             bf16 weights / f32 biases.
    noise_key: PRNG key (training=True) or None (eval).
    """
    B = x.shape[0]
    K, Np = kparams["w_mu_t"].shape                 # K = in_features (unpadded), Np lane-padded
    assert K == in_features

    vmem_cap = _vmem_capacity_bytes()
    tb_cap = 2048 if vmem_cap >= (100 << 20) else 1024     # v5e/v6e (128 MiB) vs v7x (64 MiB)

    # Batch tile: balanced across the grid (minimal padding), sublane-rounded, cdiv grid.
    n_bt = max(1, _cdiv(B, tb_cap))
    TB = _round_up(_cdiv(B, n_bt), SUBLANE)
    # N tile: multiple of 128; >= 2 blocks when possible so v7x's two TCs split the panel.
    TN = 256 if (Np >= 512 and Np % 256 == 0) else Np
    # Shrink the batch tile if the streamed x/out tiles alone would crowd VMEM.
    while TB > SUBLANE and 2 * TB * (K + TN) * 4 > vmem_cap // 3:
        TB = max(SUBLANE, _round_up(TB // 2, SUBLANE))
    NB, NJ = _cdiv(B, TB), Np // TN

    x = x.astype(jnp.float32)

    # VMEM budget: Pallas double-buffers EVERY input spec (weights included).
    n_w = 2 if training else 1
    need = (2 * TB * K * 4                         # x tiles (double-buffered)
            + 2 * TB * TN * 4                      # out tiles
            + 2 * n_w * K * TN * 2                 # bf16 weight panel(s), double-counted
            + 2 * 4 * TN * 4 + 2 * K * 4           # eps / bias vectors
            + (K * TN * 2 + TN * 4 if training else 0)   # folded-weight scratch
            + (2 << 20))                           # compiler temporaries margin
    vmem_limit = int(min(max(need, 4 << 20), vmem_cap * 3 // 4))

    cost = pl.CostEstimate(
        flops=2 * B * K * Np,
        transcendentals=0,
        bytes_accessed=int(B * K * 4 * NJ + n_w * K * Np * 2 + B * Np * 4 + 4 * Np * 4),
    )

    x_spec = pl.BlockSpec((TB, K), lambda j, i: (i, 0))
    w_spec = pl.BlockSpec((K, TN), lambda j, i: (0, j))
    v_spec = pl.BlockSpec((1, TN), lambda j, i: (0, j))
    out_spec = pl.BlockSpec((TB, TN), lambda j, i: (i, j))
    out_shape = jax.ShapeDtypeStruct((B, Np), jnp.float32)

    if training:
        eps_i, eps_j = _factorized_noise(noise_key, in_features, out_features)
        eps_in = eps_i.reshape(K, 1)
        eps_out = jnp.pad(eps_j, (0, Np - out_features)).reshape(1, Np)
        out_p = pl.pallas_call(
            _noisy_linear_train_kernel,
            out_shape=out_shape,
            grid=(NJ, NB),
            in_specs=[x_spec, w_spec, w_spec,
                      pl.BlockSpec((K, 1), lambda j, i: (0, 0)),   # eps_in
                      v_spec, v_spec, v_spec],                     # eps_out, b_mu, b_sigma
            out_specs=out_spec,
            scratch_shapes=[pltpu.VMEM((K, TN), jnp.bfloat16),     # folded weight panel
                            pltpu.VMEM((1, TN), jnp.float32)],     # folded bias
            compiler_params=pltpu.CompilerParams(
                dimension_semantics=("parallel", "arbitrary"),
                vmem_limit_bytes=vmem_limit),
            cost_estimate=cost,
        )(x, kparams["w_mu_t"], kparams["w_sigma_t"], eps_in, eps_out,
          kparams["b_mu"], kparams["b_sigma"])
    else:
        out_p = pl.pallas_call(
            _noisy_linear_eval_kernel,
            out_shape=out_shape,
            grid=(NJ, NB),
            in_specs=[x_spec, w_spec, v_spec],
            out_specs=out_spec,
            compiler_params=pltpu.CompilerParams(
                dimension_semantics=("parallel", "parallel"),
                vmem_limit_bytes=vmem_limit),
            cost_estimate=cost,
        )(x, kparams["w_mu_t"], kparams["b_mu"])

    if Np != out_features:           # lane padding only; the batch dim is never padded
        out_p = out_p[:, :out_features]
    return out_p


# --------------------------- parameter handling ------------------------------
def init_noisy_linear(key, in_features, out_features, sigma_init=0.5):
    """PyTorch NoisyLinear.reset_parameters(), in the torch (out, in) layout, f32."""
    k1, k2 = jax.random.split(key)
    mu_range = 1.0 / math.sqrt(in_features)
    w_mu = jax.random.uniform(k1, (out_features, in_features), jnp.float32,
                              -mu_range, mu_range)
    b_mu = jax.random.uniform(k2, (out_features,), jnp.float32, -mu_range, mu_range)
    w_sigma = jnp.full((out_features, in_features),
                       sigma_init / math.sqrt(in_features), jnp.float32)
    b_sigma = jnp.full((out_features,),
                       sigma_init / math.sqrt(out_features), jnp.float32)
    return {"w_mu": w_mu, "w_sigma": w_sigma, "b_mu": b_mu, "b_sigma": b_sigma}


def prepare_kernel_params(params):
    """One-time layout prep (NOT per forward call): transpose to (in, out), zero-pad the
    output dim to the 128-lane width, store weights as bf16 (halves HBM traffic & VMEM)
    and biases as f32."""
    out_f, in_f = params["w_mu"].shape
    Np = _round_up(out_f, LANE)
    padw = lambda a: jnp.pad(a.astype(jnp.float32).T,
                             ((0, 0), (0, Np - out_f))).astype(jnp.bfloat16)
    padb = lambda a: jnp.pad(a.astype(jnp.float32), (0, Np - out_f)).reshape(1, Np)
    return {
        "w_mu_t": padw(params["w_mu"]),
        "w_sigma_t": padw(params["w_sigma"]),
        "b_mu": padb(params["b_mu"]),
        "b_sigma": padb(params["b_sigma"]),
    }


# ------------------------------ reference ------------------------------------
def noisy_linear_ref(x, params, eps_i=None, eps_j=None, training=False):
    """Pure-f32 PyTorch semantics."""
    if training:
        w = params["w_mu"] + params["w_sigma"] * jnp.outer(eps_j, eps_i)
        b = params["b_mu"] + params["b_sigma"] * eps_j
    else:
        w, b = params["w_mu"], params["b_mu"]
    return x @ w.T + b


# --------------------------------- demo --------------------------------------
if __name__ == "__main__":
    key = jax.random.PRNGKey(0)
    k_param, k_x, k_noise = jax.random.split(key, 3)

    batch, in_features, out_features = 8, 16, 4
    params = init_noisy_linear(k_param, in_features, out_features)
    kparams = prepare_kernel_params(params)          # one-time layout / bf16 / pad
    x = jax.random.normal(k_x, (batch, in_features), jnp.float32)

    # Quantized operands used to emulate the kernel's bf16-MXU / f32-accumulate math.
    x_q = x.astype(jnp.bfloat16).astype(jnp.float32)
    w_mu_q = params["w_mu"].astype(jnp.bfloat16).astype(jnp.float32)
    w_sig_q = params["w_sigma"].astype(jnp.bfloat16).astype(jnp.float32)

    # ----- eval mode (deterministic, mu-only specialized kernel) -----
    q_eval = jax.block_until_ready(noisy_linear_forward(
        x, kparams, None,
        in_features=in_features, out_features=out_features, training=False))
    assert q_eval.shape == (batch, out_features)
    q_eval_emu = x_q @ w_mu_q.T + params["b_mu"]                      # exact kernel math
    assert jnp.allclose(q_eval, q_eval_emu, atol=1e-4, rtol=1e-4)
    assert jnp.allclose(q_eval, noisy_linear_ref(x, params, training=False),
                        atol=1e-1, rtol=1e-1)                         # f32 semantics, bf16 tol

    # ----- training mode (mu + sigma * eps fold inside the kernel) -----
    q_tr = jax.block_until_ready(noisy_linear_forward(
        x, kparams, k_noise,
        in_features=in_features, out_features=out_features, training=True))
    assert q_tr.shape == (batch, out_features)
    eps_i, eps_j = _factorized_noise(k_noise, in_features, out_features)
    w_eff_q = (w_mu_q + w_sig_q * jnp.outer(eps_j, eps_i)
               ).astype(jnp.bfloat16).astype(jnp.float32)
    b_eff = params["b_mu"] + params["b_sigma"] * eps_j
    q_tr_emu = x_q @ w_eff_q.T + b_eff                                # exact kernel math
    assert jnp.allclose(q_tr, q_tr_emu, atol=1e-4, rtol=1e-4)
    assert jnp.allclose(q_tr, noisy_linear_ref(x, params, eps_i, eps_j, training=True),
                        atol=1e-1, rtol=1e-1)

    print("KERNEL_OK")
</pallas_src>

<mosaic_0001>
module attributes {stable_mosaic.version = 11 : i64} {
  func.func @_noisy_linear_eval_kernel(%arg0: i32, %arg1: i32, %arg2: memref<8x16xf32, #tpu.memory_space<vmem>>, %arg3: memref<16x128xbf16, #tpu.memory_space<vmem>>, %arg4: memref<1x128xf32, #tpu.memory_space<vmem>>, %arg5: memref<8x128xf32, #tpu.memory_space<vmem>>) attributes {dimension_semantics = [#tpu.dimension_semantics<parallel>, #tpu.dimension_semantics<parallel>], iteration_bounds = array<i64: 1, 1>, scalar_prefetch = 0 : i64, scratch_operands = 0 : i64, tpu.core_type = #tpu.core_type<tc>, window_params = [{transform_indices = @transform_0, window_bounds = array<i64: 8, 16>}, {transform_indices = @transform_1, window_bounds = array<i64: 16, 128>}, {transform_indices = @transform_2, window_bounds = array<i64: 1, 128>}, {transform_indices = @transform_3, window_bounds = array<i64: 8, 128>}]} {
    %c0 = arith.constant 0 : index
    %c0_0 = arith.constant 0 : index
    %0 = vector.load %arg2[%c0, %c0_0] : memref<8x16xf32, #tpu.memory_space<vmem>>, vector<8x16xf32>
    %1 = arith.truncf %0 : vector<8x16xf32> to vector<8x16xbf16>
    %c0_1 = arith.constant 0 : index
    %c0_2 = arith.constant 0 : index
    %2 = vector.load %arg3[%c0_1, %c0_2] : memref<16x128xbf16, #tpu.memory_space<vmem>>, vector<16x128xbf16>
    %cst = arith.constant dense<0.000000e+00> : vector<8x128xf32>
    %3 = tpu.matmul %1, %2, %cst {dimension_numbers = #tpu.dot_dimension_numbers<[1], [0], [0], [1], [0, 0, 1, 1], [], []>} : vector<8x16xbf16>, vector<16x128xbf16>, vector<8x128xf32> -> vector<8x128xf32>
    %c0_3 = arith.constant 0 : index
    %c0_4 = arith.constant 0 : index
    %4 = vector.load %arg4[%c0_3, %c0_4] : memref<1x128xf32, #tpu.memory_space<vmem>>, vector<1x128xf32>
    %5 = vector.broadcast %4 : vector<1x128xf32> to vector<8x128xf32>
    %6 = arith.addf %3, %5 : vector<8x128xf32>
    %c0_5 = arith.constant 0 : index
    %c0_6 = arith.constant 0 : index
    %7 = vector.load %arg5[%c0_5, %c0_6] : memref<8x128xf32, #tpu.memory_space<vmem>>, vector<8x128xf32>
    tpu.vector_store %arg5[%c0_5, %c0_6], %6 {strides = array<i32>} : memref<8x128xf32, #tpu.memory_space<vmem>>, vector<8x128xf32>,
    return
  }
  func.func @transform_0(%arg0: i32, %arg1: i32) -> (i32, i32) {
    %c0_i32 = arith.constant 0 : i32
    %c0_i32_0 = arith.constant 0 : i32
    return %arg1, %c0_i32 : i32, i32
  }
  func.func @transform_1(%arg0: i32, %arg1: i32) -> (i32, i32) {
    %c0_i32 = arith.constant 0 : i32
    %c0_i32_0 = arith.constant 0 : i32
    return %c0_i32, %arg0 : i32, i32
  }
  func.func @transform_2(%arg0: i32, %arg1: i32) -> (i32, i32) {
    %c0_i32 = arith.constant 0 : i32
    %c0_i32_0 = arith.constant 0 : i32
    return %c0_i32, %arg0 : i32, i32
  }
  func.func @transform_3(%arg0: i32, %arg1: i32) -> (i32, i32) {
    %c0_i32 = arith.constant 0 : i32
    return %arg1, %arg0 : i32, i32
  }
}

</mosaic_0001>

<bundles_post_ra>
// kernel: noisy_linear_forward.1
= control target key start
LH: loop header
LB: loop body
LE: loop exit
PB: predicated region body
PF: predicated region fallthrough
CT: control target
= control target key end

     0   :  { %8 = vsyncpa [#allocation3], 0  ;;  %s221_s0 = inlined_call_operand.hbm [shape: f32[8,16], index: 0, kind: input, shape index: {}]   ;;  %s222_s1 = inlined_call_operand.hbm [shape: bf16[16,128], index: 1, kind: input, shape index: {}]   ;;  %s223_s2 = inlined_call_operand.hbm [shape: f32[1,128], index: 2, kind: input, shape index: {}]   ;;  %s224_s3 = inlined_call_operand.vmem [shape: f32[8,128], index: 3, kind: output, shape index: {}]  }
   0x1   :  { %9 = vsyncpa [#allocation5], 0  ;;  %s25_s14 = sshll.u32 %s222_s1, 4  ;;  %s184_s15 = smov [#allocation4]   ;;  %s26_s14 = int_to_ptr.hbm [resolvable:$true] %s25_s14 }
   0x2   :  { %s27_s16 = sshll.u32 %s184_s15, 4  ;;  %s15_s19 = sshll.u32 %s221_s0, 4  ;;  %s28_s16 = int_to_ptr.vmem [resolvable:$true] %s27_s16  ;;  %s16_s19 = int_to_ptr.hbm [resolvable:$true] %s15_s19 }
   0x3   :  { %s185_s20 = smov 64   ;;  %s186_s21 = smov 4  }
   0x4   :  { %33 = dma.hbm_to_vmem [thread:$0]  %s26_s14, 128, %s28_s16, [#allocation5], %s185_s20, %s185_s20, %s186_s21  }
   0x5   :  { %s187_s22 = smov [#allocation2]   ;;  %s39_s26 = sshll.u32 %s223_s2, 4  ;;  %s40_s26 = int_to_ptr.hbm [resolvable:$true] %s39_s26 }
   0x6   :  { %s17_s23 = sshll.u32 %s187_s22, 4  ;;  %s188_s1 = smov [#allocation6]   ;;  %s18_s23 = int_to_ptr.vmem [resolvable:$true] %s17_s23 }
   0x7   :  { %20 = dma.hbm_to_vmem [thread:$0]  %s16_s19, 128, %s18_s23, [#allocation3]  }
   0x8   :  { %s41_s27 = sshll.u32 %s188_s1, 4  ;;  %s42_s27 = int_to_ptr.vmem [resolvable:$true] %s41_s27 }
   0x9   :  { %44 = dma.hbm_to_vmem [thread:$0]  %s40_s26, 16, %s42_s27, [#allocation5]  }
   0xa   :  { %180 = dma.done.wait [#allocation3], 128  }
   0xb   :  { %181 = vsyncadd [#allocation3], 4294967168 }
   0xc   :  { %182 = dma.done.wait [#allocation5], 144  }
   0xd   :  { %183 = vsyncadd [#allocation5], 4294967152  ;;  %v101_v0 = vld [vmem:[#allocation4] sm:$0xff]  ;;  %v58_v1 = vld [vmem:[#allocation2] sm:$0xff]  ;;  %vm72_vm0 = vcmask 130048  }
   0xe   :  { %v59_v2 = vpack.c.bf16 %v58_v1, %v58_v1  ;;  %83 = vmatpush.bf16.msra.mxu0 %v101_v0  ;;  %v107_v3 = vld [vmem:[#allocation6] ss:$0 sm:$0xff] }
  0x11   :  { %100 = vmatmul.msk.bf16.vlgmr.msra.gmra.mxu0 %vm72_vm0, %v59_v2 }
  0x8e   :  { %v85_v4 = vpop.f32.mrf.mxu0 }
  0x8f   :  { %v86_v5 = vadd.f32 %v107_v3, %v85_v4 }
  0x91   :  { %89 = vst [vmem:[%s224_s3] sm:$0xff] %v86_v5 }
  0x96   :  { %v87_v6 = vpop.f32.mrf.mxu0 }
  0x97   :  { %94 = vsyncpa [#allocation3], 1 }
  0x98   :  { %95 = vsyncpa [#allocation5], 1 }

</bundles_post_ra>
